<compile_context>
chip_gen: v5e
topology: v5e:2x2
jax: 0.10.0
libtpu: 0.0.40
codegen_flags: <defaults>
</compile_context>

<pallas_src>
import jax
import jax.numpy as jnp
from jax.experimental import pallas as pl
from jax.experimental.pallas import tpu as pltpu


def _fma_kernel_bd(times_ref, w_ref, b_ref, out_ref):
    # times: (TB, 1), w: (1, dim), b: (1, dim) -> out: (TB, dim)
    out_ref[...] = (times_ref[...] * w_ref[...] + b_ref[...]).astype(out_ref.dtype)


def _fma_kernel_db(times_ref, w_ref, b_ref, out_ref):
    # Lane-dense transposed form: times: (1, TB), w: (dim, 1), b: (dim, 1)
    # -> out: (dim, TB)  (batch on the 128-lane axis)
    out_ref[...] = (w_ref[...] * times_ref[...] + b_ref[...]).astype(out_ref.dtype)


def fourier_embedding(times, w_proj, b_proj, *, block_b=2048, out_dtype=None):
    """FourierEmbedding.forward: returns rand_proj = times @ W.T + b.

    times:  (B, 1) f32
    w_proj: (1, dim) f32   (torch nn.Linear(1, dim).weight, stored input-major)
    b_proj: (dim,) or (1, dim) f32
    block_b must be a multiple of 128 (default 2048).
    """
    assert block_b % 128 == 0, "block_b must be a multiple of 128"
    B = times.shape[0]
    dim = w_proj.shape[-1]
    out_dtype = out_dtype if out_dtype is not None else times.dtype

    w = w_proj.reshape(1, dim).astype(jnp.float32)
    b = b_proj.reshape(1, dim).astype(jnp.float32)

    params = pltpu.CompilerParams(dimension_semantics=("parallel",))

    if dim >= 128 or B < 128:
        # Natural (B, dim) layout. For dim >= 128 output is already lane-dense;
        # for B < 128 the whole problem fits in one tiny block (no transpose
        # plumbing is worth it).
        bytes_per_row = dim * jnp.dtype(out_dtype).itemsize
        # ~2 MiB per output tile (double-buffered ~4 MiB), multiple of 8 rows.
        max_rows = max(8, ((2 * 1024 * 1024) // max(bytes_per_row, 1)) // 8 * 8)
        tb = min(block_b, max_rows)
        tb = B if B <= tb else tb
        grid = (pl.cdiv(B, tb),)
        return pl.pallas_call(
            _fma_kernel_bd,
            out_shape=jax.ShapeDtypeStruct((B, dim), out_dtype),
            grid=grid,
            in_specs=[pl.BlockSpec((tb, 1), lambda i: (i, 0)),
                      pl.BlockSpec((1, dim), lambda i: (0, 0)),
                      pl.BlockSpec((1, dim), lambda i: (0, 0))],
            out_specs=pl.BlockSpec((tb, dim), lambda i: (i, 0)),
            compiler_params=params,
        )(times, w, b)

    # dim < 128 and B >= 128: transposed layout, batch on the lane axis ->
    # lane-dense stores (unmasked vst instead of vst.msk).
    times_row = times.reshape(1, B)                  # order-preserving reshape of (B, 1)
    w_col = w.reshape(dim, 1)
    b_col = b.reshape(dim, 1)
    tb = B if B <= block_b else block_b              # multiple of 128 (or full B)
    grid = (pl.cdiv(B, tb),)
    out_t = pl.pallas_call(
        _fma_kernel_db,
        out_shape=jax.ShapeDtypeStruct((dim, B), out_dtype),
        grid=grid,
        in_specs=[pl.BlockSpec((1, tb), lambda i: (0, i)),
                  pl.BlockSpec((dim, 1), lambda i: (0, 0)),
                  pl.BlockSpec((dim, 1), lambda i: (0, 0))],
        out_specs=pl.BlockSpec((dim, tb), lambda i: (0, i)),
        compiler_params=params,
    )(times_row, w_col, b_col)
    # TODO(synk): consumers that accept a (dim, B) slab should take out_t directly
    # and skip this wrapper transpose (it is pure layout plumbing).
    return out_t.T


def fourier_embedding_ref(times, w_proj, b_proj):
    dim = w_proj.shape[-1]
    return times * w_proj.reshape(1, dim) + b_proj.reshape(1, dim)


if __name__ == "__main__":
    key = jax.random.PRNGKey(0)

    # --- Case 1: tiny (B < 128, dim < 128) -> single-block natural path -------
    B, dim = 8, 32
    k_t, k_w, k_b, key = jax.random.split(key, 4)
    times = jax.random.normal(k_t, (B, 1), dtype=jnp.float32)
    # nn.Linear(1, dim): init bound = 1/sqrt(in_features) = 1.0
    w_proj = jax.random.uniform(k_w, (1, dim), minval=-1.0, maxval=1.0, dtype=jnp.float32)
    b_proj = jax.random.uniform(k_b, (1, dim), minval=-1.0, maxval=1.0, dtype=jnp.float32)

    out = jax.block_until_ready(fourier_embedding(times, w_proj, b_proj))
    ref = fourier_embedding_ref(times, w_proj, b_proj)
    assert out.shape == (B, dim)
    assert jnp.allclose(out, ref, atol=1e-6, rtol=1e-6), "mismatch (tiny path)"

    # --- Case 2: dim >= 128, grid > 1 -> natural batch-tiled path -------------
    B2, dim2 = 384, 128
    k_t2, k_w2, k_b2, key = jax.random.split(key, 4)
    times2 = jax.random.normal(k_t2, (B2, 1), dtype=jnp.float32)
    w2 = jax.random.uniform(k_w2, (1, dim2), minval=-1.0, maxval=1.0, dtype=jnp.float32)
    b2 = jax.random.uniform(k_b2, (1, dim2), minval=-1.0, maxval=1.0, dtype=jnp.float32)

    out2 = jax.block_until_ready(fourier_embedding(times2, w2, b2))
    ref2 = fourier_embedding_ref(times2, w2, b2)
    assert out2.shape == (B2, dim2)
    assert jnp.allclose(out2, ref2, atol=1e-6, rtol=1e-6), "mismatch (dim>=128 path)"

    # --- Case 3: dim < 128, B >= 128 -> lane-dense transposed path, grid > 1 --
    B3, dim3 = 256, 32
    k_t3, k_w3, k_b3, key = jax.random.split(key, 4)
    times3 = jax.random.normal(k_t3, (B3, 1), dtype=jnp.float32)
    w3 = jax.random.uniform(k_w3, (1, dim3), minval=-1.0, maxval=1.0, dtype=jnp.float32)
    b3 = jax.random.uniform(k_b3, (1, dim3), minval=-1.0, maxval=1.0, dtype=jnp.float32)

    out3 = jax.block_until_ready(fourier_embedding(times3, w3, b3, block_b=128))
    ref3 = fourier_embedding_ref(times3, w3, b3)
    assert out3.shape == (B3, dim3)
    assert jnp.allclose(out3, ref3, atol=1e-6, rtol=1e-6), "mismatch (transposed path)"

    print("KERNEL_OK")
</pallas_src>

<mosaic_0001>
module attributes {stable_mosaic.version = 11 : i64} {
  func.func @_fma_kernel_bd(%arg0: i32, %arg1: memref<8x1xf32, #tpu.memory_space<vmem>>, %arg2: memref<1x32xf32, #tpu.memory_space<vmem>>, %arg3: memref<1x32xf32, #tpu.memory_space<vmem>>, %arg4: memref<8x32xf32, #tpu.memory_space<vmem>>) attributes {dimension_semantics = [#tpu.dimension_semantics<parallel>], iteration_bounds = array<i64: 1>, scalar_prefetch = 0 : i64, scratch_operands = 0 : i64, tpu.core_type = #tpu.core_type<tc>, window_params = [{transform_indices = @transform_0, window_bounds = array<i64: 8, 1>}, {pipeline_mode = #tpu.pipeline_mode<synchronous>, transform_indices = @transform_1, window_bounds = array<i64: 1, 32>}, {pipeline_mode = #tpu.pipeline_mode<synchronous>, transform_indices = @transform_2, window_bounds = array<i64: 1, 32>}, {transform_indices = @transform_3, window_bounds = array<i64: 8, 32>}]} {
    %c0 = arith.constant 0 : index
    %c0_0 = arith.constant 0 : index
    %0 = vector.load %arg1[%c0, %c0_0] : memref<8x1xf32, #tpu.memory_space<vmem>>, vector<8x1xf32>
    %c0_1 = arith.constant 0 : index
    %c0_2 = arith.constant 0 : index
    %1 = vector.load %arg2[%c0_1, %c0_2] : memref<1x32xf32, #tpu.memory_space<vmem>>, vector<1x32xf32>
    %2 = vector.broadcast %0 : vector<8x1xf32> to vector<8x32xf32>
    %3 = vector.broadcast %1 : vector<1x32xf32> to vector<8x32xf32>
    %4 = arith.mulf %2, %3 : vector<8x32xf32>
    %c0_3 = arith.constant 0 : index
    %c0_4 = arith.constant 0 : index
    %5 = vector.load %arg3[%c0_3, %c0_4] : memref<1x32xf32, #tpu.memory_space<vmem>>, vector<1x32xf32>
    %6 = vector.broadcast %5 : vector<1x32xf32> to vector<8x32xf32>
    %7 = arith.addf %4, %6 : vector<8x32xf32>
    %c0_5 = arith.constant 0 : index
    %c0_6 = arith.constant 0 : index
    %8 = vector.load %arg4[%c0_5, %c0_6] : memref<8x32xf32, #tpu.memory_space<vmem>>, vector<8x32xf32>
    tpu.vector_store %arg4[%c0_5, %c0_6], %7 {strides = array<i32>} : memref<8x32xf32, #tpu.memory_space<vmem>>, vector<8x32xf32>,
    return
  }
  func.func @transform_0(%arg0: i32) -> (i32, i32) {
    %c0_i32 = arith.constant 0 : i32
    %c0_i32_0 = arith.constant 0 : i32
    return %arg0, %c0_i32 : i32, i32
  }
  func.func @transform_1(%arg0: i32) -> (i32, i32) {
    %c0_i32 = arith.constant 0 : i32
    %c0_i32_0 = arith.constant 0 : i32
    %c0_i32_1 = arith.constant 0 : i32
    return %c0_i32, %c0_i32_0 : i32, i32
  }
  func.func @transform_2(%arg0: i32) -> (i32, i32) {
    %c0_i32 = arith.constant 0 : i32
    %c0_i32_0 = arith.constant 0 : i32
    %c0_i32_1 = arith.constant 0 : i32
    return %c0_i32, %c0_i32_0 : i32, i32
  }
  func.func @transform_3(%arg0: i32) -> (i32, i32) {
    %c0_i32 = arith.constant 0 : i32
    %c0_i32_0 = arith.constant 0 : i32
    return %arg0, %c0_i32 : i32, i32
  }
}

</mosaic_0001>

<bundles_post_ra>
// kernel: tpu_custom_call.1
= control target key start
LH: loop header
LB: loop body
LE: loop exit
PB: predicated region body
PF: predicated region fallthrough
CT: control target
= control target key end

     0   :  { %v80_v1 = vmov 0   ;;  %s114_s0 = inlined_call_operand.vmem [shape: f32[8,1], index: 0, kind: input, shape index: {}]   ;;  %s115_s1 = inlined_call_operand.vmem [shape: f32[1,32], index: 1, kind: input, shape index: {}]   ;;  %s116_s2 = inlined_call_operand.vmem [shape: f32[1,32], index: 2, kind: input, shape index: {}]   ;;  %s117_s3 = inlined_call_operand.hbm [shape: f32[8,32], index: 3, kind: output, shape index: {}]  }
   0x1   :  { %v15_v0 = vld [vmem:[%s114_s0] sm:$0xff]  ;;  %51 = vset.pattern.permute.xlu0 %v80_v1 }
   0x2   :  { %8 = vsyncpa [#allocation3], 0  ;;  %19 = vperm.xlu0 %51, %v15_v0   ;;  %v52_v2 = vld [vmem:[%s115_s1] ss:$0 sm:$0xff]  ;;  %s81_s18 = smov [#allocation2]   ;;  %s40_s22 = sshll.u32 %s117_s3, 4  ;;  %s41_s22 = int_to_ptr.hbm [resolvable:$true] %s40_s22 }
   0x3   :  { %v53_v3 = vld [vmem:[%s116_s2] ss:$0 sm:$0xff]  ;;  %s38_s19 = sshll.u32 %s81_s18, 4  ;;  %vm31_vm0 = vcmask 261120   ;;  %s39_s19 = int_to_ptr.vmem [resolvable:$true] %s38_s19 }
  0x74   :  { %v20_v4 = vpop.permute.xlu0 %19 }
  0x75   :  { %v25_v5 = vmul.f32 %v52_v2, %v20_v4 }
  0x77   :  { %v30_v6 = vadd.f32 %v53_v3, %v25_v5 }
  0x79   :  { %32 = vst.msk [vmem:[#allocation2] sm:$0xff] %vm31_vm0, %v30_v6 }
  0x7a   :  { %43 = dma.vmem_to_hbm [thread:$0]  %s39_s19, 128, %s41_s22, [#allocation3]  }
  0x7b   :  { %78 = dma.done.wait [#allocation3], 128  }
  0x7c   :  { %79 = vsyncadd [#allocation3], 4294967168 }
  0x7d   :  { %48 = vsyncpa [#allocation3], 1 }

</bundles_post_ra>
